<compile_context>
chip_gen: v5e
topology: v5e:2x2
jax: 0.10.0
libtpu: 0.0.40
codegen_flags: <defaults>
</compile_context>

<pallas_src>
import jax
import jax.numpy as jnp
from jax.experimental import pallas as pl
from jax.experimental.pallas import tpu as pltpu


def _conv1x1_vpu_kernel(x_ref, w_ref, b_ref, o_ref):
    """Small-channel path: contraction on the VPU as an unrolled broadcast-FMA.

    x_ref: (1, C_in, TN)   w_ref: (C_out, C_in)   b_ref: (C_out, 1)
    o_ref: (1, C_out, TN)  -- lanes = pixels, so stores are lane-dense.
    """
    x = x_ref[0].astype(jnp.float32)            # (C_in, TN)
    w = w_ref[...].astype(jnp.float32)          # (C_out, C_in)
    c_in, tn = x.shape
    c_out = w.shape[0]
    acc = jnp.zeros((c_out, tn), jnp.float32)
    # Static unroll over the tiny contraction dim: pure VPU work; keeps the MXU
    # push/pop latency off the critical path when the MXU would be ~1% utilized.
    for ci in range(c_in):
        acc = acc + w[:, ci:ci + 1] * x[ci:ci + 1, :]
    o_ref[0] = (acc + b_ref[...].astype(jnp.float32)).astype(o_ref.dtype)


def _conv1x1_mxu_kernel(x_ref, w_ref, b_ref, o_ref):
    """Large-channel path: (C_out, C_in) @ (C_in, TN) on the MXU, f32 accumulate."""
    acc = jnp.dot(w_ref[...], x_ref[0], preferred_element_type=jnp.float32)
    o_ref[0] = (acc + b_ref[...].astype(jnp.float32)).astype(o_ref.dtype)


def zero_conv2d(x_nchw, weight, bias, *, target_tile_n=1024,
                vmem_block_budget_bytes=40 * 1024 * 1024):
    """1x1 stride-1 conv, no padding. Equivalent to PyTorch nn.Conv2d(Cin, Cout, 1).

    x_nchw : [B, C_in, H, W]
    weight : [C_out, C_in, 1, 1]   (PyTorch nn.Conv2d layout)
    bias   : [C_out]
    returns: [B, C_out, H, W]
    """
    B, C_in, H, W = x_nchw.shape
    C_out = weight.shape[0]
    HW = H * W
    dtype = x_nchw.dtype
    itemsize = jnp.dtype(dtype).itemsize

    # Stay in NCHW: free reshapes only (no transpose / pad / slice copies in HBM).
    x3 = x_nchw.reshape(B, C_in, HW)
    w_mat = weight.reshape(C_out, C_in).astype(dtype)
    b_mat = bias.reshape(C_out, 1)

    # Pixel-tile selection: large, lane-dense (multiple of 128) tiles, capped so
    # the double-buffered working set fits well inside v7x's 64 MiB/TC VMEM
    # (v5e/v6e have 128 MiB, so the same cap is conservative there).
    tile_n = max(128, (int(target_tile_n) // 128) * 128)

    def _blocks_vmem_bytes(tn):
        return (2 * tn * (C_in + C_out) * itemsize      # double-buffered x / out tiles
                + 2 * C_in * C_out * itemsize           # weight (constant index map)
                + 2 * C_out * itemsize)                 # bias

    while tile_n > 128 and _blocks_vmem_bytes(tile_n) > vmem_block_budget_bytes:
        tile_n -= 128
    if HW <= tile_n:
        tile_n = HW                       # single full-extent block (always legal)
    grid = (B, pl.cdiv(HW, tile_n))       # ragged tail -> Pallas OOB masking, no pad

    # Dispatch: small channel counts -> VPU broadcast-FMA; otherwise MXU matmul.
    kernel = _conv1x1_vpu_kernel if (C_in <= 32 and C_out <= 32) else _conv1x1_mxu_kernel

    y3 = pl.pallas_call(
        kernel,
        out_shape=jax.ShapeDtypeStruct((B, C_out, HW), dtype),
        grid_spec=pltpu.PrefetchScalarGridSpec(
            num_scalar_prefetch=0,
            grid=grid,
            in_specs=[
                pl.BlockSpec((1, C_in, tile_n), lambda b, j: (b, 0, j)),
                # Constant index maps: weight & bias are fetched once and stay
                # resident in VMEM across the whole grid.
                pl.BlockSpec((C_out, C_in), lambda b, j: (0, 0)),
                pl.BlockSpec((C_out, 1), lambda b, j: (0, 0)),
            ],
            out_specs=pl.BlockSpec((1, C_out, tile_n), lambda b, j: (b, 0, j)),
        ),
        compiler_params=pltpu.CompilerParams(
            # Both axes are embarrassingly parallel -> megacore / 2-TC sharding on v7x.
            dimension_semantics=("parallel", "parallel"),
            # Raise the scoped VMEM limit (16 MiB default on v5e, 32 MiB on v6e/v7x)
            # so the large lane-dense tiles can be fully pipelined.
            vmem_limit_bytes=64 * 1024 * 1024,
        ),
    )(x3, w_mat, b_mat)

    return y3.reshape(B, C_out, H, W)


if __name__ == "__main__":
    key = jax.random.PRNGKey(0)

    # --- ZeroConv2d shapes (small, consistent with the module) -----------------
    B, C_in, C_out, H, W = 2, 4, 8, 16, 16
    x = jax.random.normal(key, (B, C_in, H, W), dtype=jnp.float32)

    # ZeroConv2d.__init__: Conv2d(in, out, kernel_size=1), weight & bias zeroed.
    weight = jnp.zeros((C_out, C_in, 1, 1), dtype=jnp.float32)
    bias = jnp.zeros((C_out,), dtype=jnp.float32)

    y = jax.block_until_ready(zero_conv2d(x, weight, bias))
    assert y.shape == (B, C_out, H, W), y.shape
    assert bool(jnp.all(y == 0.0)), "zero conv should produce zeros"

    # --- General correctness, small-channel (VPU) path, exact f32 reference ----
    k1, k2 = jax.random.split(key)
    w_nz = jax.random.normal(k1, (C_out, C_in, 1, 1), dtype=jnp.float32)
    b_nz = jax.random.normal(k2, (C_out,), dtype=jnp.float32)
    y_nz = jax.block_until_ready(zero_conv2d(x, w_nz, b_nz))
    # Element-wise f32 reference (no matmul-precision ambiguity).
    ref = (x[:, None, :, :, :] * w_nz.reshape(C_out, C_in)[None, :, :, None, None]
           ).sum(axis=2) + b_nz[None, :, None, None]
    assert jnp.allclose(y_nz, ref, atol=1e-5, rtol=1e-5), \
        float(jnp.max(jnp.abs(y_nz - ref)))

    # --- Larger channel counts exercise the MXU path (bf16 streamed operands) --
    B2, C2_in, C2_out, H2, W2 = 1, 48, 64, 16, 16
    k3, k4, k5 = jax.random.split(key, 3)
    x2 = jax.random.normal(k3, (B2, C2_in, H2, W2), dtype=jnp.bfloat16)
    w2 = jax.random.normal(k4, (C2_out, C2_in, 1, 1), dtype=jnp.bfloat16)
    b2 = jax.random.normal(k5, (C2_out,), dtype=jnp.bfloat16)
    y2 = jax.block_until_ready(zero_conv2d(x2, w2, b2))
    assert y2.shape == (B2, C2_out, H2, W2), y2.shape
    ref2 = (x2.astype(jnp.float32)[:, None, :, :, :]
            * w2.reshape(C2_out, C2_in).astype(jnp.float32)[None, :, :, None, None]
            ).sum(axis=2) + b2.astype(jnp.float32)[None, :, None, None]
    # Tolerance covers bf16 rounding of the stored output.
    assert jnp.allclose(y2.astype(jnp.float32), ref2, atol=2e-2, rtol=2e-2), \
        float(jnp.max(jnp.abs(y2.astype(jnp.float32) - ref2)))

    print("KERNEL_OK")
</pallas_src>

<mosaic_0001>
module attributes {stable_mosaic.version = 11 : i64} {
  func.func @_conv1x1_vpu_kernel(%arg0: i32, %arg1: i32, %arg2: memref<1x4x256xf32, #tpu.memory_space<vmem>>, %arg3: memref<8x4xf32, #tpu.memory_space<vmem>>, %arg4: memref<8x1xf32, #tpu.memory_space<vmem>>, %arg5: memref<1x8x256xf32, #tpu.memory_space<vmem>>) attributes {dimension_semantics = [#tpu.dimension_semantics<parallel>, #tpu.dimension_semantics<parallel>], iteration_bounds = array<i64: 2, 1>, scalar_prefetch = 0 : i64, scratch_operands = 0 : i64, tpu.core_type = #tpu.core_type<tc>, window_params = [{transform_indices = @transform_0, window_bounds = array<i64: 1, 4, 256>}, {pipeline_mode = #tpu.pipeline_mode<synchronous>, transform_indices = @transform_1, window_bounds = array<i64: 8, 4>}, {pipeline_mode = #tpu.pipeline_mode<synchronous>, transform_indices = @transform_2, window_bounds = array<i64: 8, 1>}, {transform_indices = @transform_3, window_bounds = array<i64: 1, 8, 256>}]} {
    %c0 = arith.constant 0 : index
    %c0_0 = arith.constant 0 : index
    %c0_1 = arith.constant 0 : index
    %0 = vector.load %arg2[%c0, %c0_0, %c0_1] : memref<1x4x256xf32, #tpu.memory_space<vmem>>, vector<1x4x256xf32>
    %1 = vector.shape_cast %0 : vector<1x4x256xf32> to vector<4x256xf32>
    %c0_2 = arith.constant 0 : index
    %c0_3 = arith.constant 0 : index
    %2 = vector.load %arg3[%c0_2, %c0_3] : memref<8x4xf32, #tpu.memory_space<vmem>>, vector<8x4xf32>
    %cst = arith.constant 0.000000e+00 : f32
    %3 = vector.broadcast %cst : f32 to vector<8x256xf32>
    %4 = vector.extract_strided_slice %2 {offsets = [0, 0], sizes = [8, 1], strides = [1, 1]} : vector<8x4xf32> to vector<8x1xf32>
    %5 = vector.extract_strided_slice %1 {offsets = [0, 0], sizes = [1, 256], strides = [1, 1]} : vector<4x256xf32> to vector<1x256xf32>
    %6 = vector.broadcast %4 : vector<8x1xf32> to vector<8x256xf32>
    %7 = vector.broadcast %5 : vector<1x256xf32> to vector<8x256xf32>
    %8 = arith.mulf %6, %7 : vector<8x256xf32>
    %9 = arith.addf %3, %8 : vector<8x256xf32>
    %10 = vector.extract_strided_slice %2 {offsets = [0, 1], sizes = [8, 1], strides = [1, 1]} : vector<8x4xf32> to vector<8x1xf32>
    %11 = vector.extract_strided_slice %1 {offsets = [1, 0], sizes = [1, 256], strides = [1, 1]} : vector<4x256xf32> to vector<1x256xf32>
    %12 = vector.broadcast %10 : vector<8x1xf32> to vector<8x256xf32>
    %13 = vector.broadcast %11 : vector<1x256xf32> to vector<8x256xf32>
    %14 = arith.mulf %12, %13 : vector<8x256xf32>
    %15 = arith.addf %9, %14 : vector<8x256xf32>
    %16 = vector.extract_strided_slice %2 {offsets = [0, 2], sizes = [8, 1], strides = [1, 1]} : vector<8x4xf32> to vector<8x1xf32>
    %17 = vector.extract_strided_slice %1 {offsets = [2, 0], sizes = [1, 256], strides = [1, 1]} : vector<4x256xf32> to vector<1x256xf32>
    %18 = vector.broadcast %16 : vector<8x1xf32> to vector<8x256xf32>
    %19 = vector.broadcast %17 : vector<1x256xf32> to vector<8x256xf32>
    %20 = arith.mulf %18, %19 : vector<8x256xf32>
    %21 = arith.addf %15, %20 : vector<8x256xf32>
    %22 = vector.extract_strided_slice %2 {offsets = [0, 3], sizes = [8, 1], strides = [1, 1]} : vector<8x4xf32> to vector<8x1xf32>
    %23 = vector.extract_strided_slice %1 {offsets = [3, 0], sizes = [1, 256], strides = [1, 1]} : vector<4x256xf32> to vector<1x256xf32>
    %24 = vector.broadcast %22 : vector<8x1xf32> to vector<8x256xf32>
    %25 = vector.broadcast %23 : vector<1x256xf32> to vector<8x256xf32>
    %26 = arith.mulf %24, %25 : vector<8x256xf32>
    %27 = arith.addf %21, %26 : vector<8x256xf32>
    %c0_4 = arith.constant 0 : index
    %c0_5 = arith.constant 0 : index
    %28 = vector.load %arg4[%c0_4, %c0_5] : memref<8x1xf32, #tpu.memory_space<vmem>>, vector<8x1xf32>
    %29 = vector.broadcast %28 : vector<8x1xf32> to vector<8x256xf32>
    %30 = arith.addf %27, %29 : vector<8x256xf32>
    %c0_6 = arith.constant 0 : index
    %c0_7 = arith.constant 0 : index
    %c0_8 = arith.constant 0 : index
    %31 = vector.load %arg5[%c0_6, %c0_7, %c0_8] : memref<1x8x256xf32, #tpu.memory_space<vmem>>, vector<1x8x256xf32>
    %32 = vector.shape_cast %31 : vector<1x8x256xf32> to vector<8x256xf32>
    %33 = vector.shape_cast %30 : vector<8x256xf32> to vector<1x8x256xf32>
    tpu.vector_store %arg5[%c0_6, %c0_7, %c0_8], %33 {strides = array<i32>} : memref<1x8x256xf32, #tpu.memory_space<vmem>>, vector<1x8x256xf32>,
    return
  }
  func.func @transform_0(%arg0: i32, %arg1: i32) -> (i32, i32, i32) {
    %c0_i32 = arith.constant 0 : i32
    %c0_i32_0 = arith.constant 0 : i32
    return %arg0, %c0_i32, %arg1 : i32, i32, i32
  }
  func.func @transform_1(%arg0: i32, %arg1: i32) -> (i32, i32) {
    %c0_i32 = arith.constant 0 : i32
    %c0_i32_0 = arith.constant 0 : i32
    %c0_i32_1 = arith.constant 0 : i32
    return %c0_i32, %c0_i32_0 : i32, i32
  }
  func.func @transform_2(%arg0: i32, %arg1: i32) -> (i32, i32) {
    %c0_i32 = arith.constant 0 : i32
    %c0_i32_0 = arith.constant 0 : i32
    %c0_i32_1 = arith.constant 0 : i32
    return %c0_i32, %c0_i32_0 : i32, i32
  }
  func.func @transform_3(%arg0: i32, %arg1: i32) -> (i32, i32, i32) {
    %c0_i32 = arith.constant 0 : i32
    %c0_i32_0 = arith.constant 0 : i32
    return %arg0, %c0_i32, %arg1 : i32, i32, i32
  }
}

</mosaic_0001>

<bundles_post_ra>
// kernel: tpu_custom_call.1
= control target key start
LH: loop header
LB: loop body
LE: loop exit
PB: predicated region body
PF: predicated region fallthrough
CT: control target
= control target key end

     0   :  { %8 = vsyncpa [#allocation3], 0  ;;  %s656_s0 = inlined_call_operand.vmem [shape: f32[2,4,256], index: 0, kind: input, shape index: {}]   ;;  %s657_s1 = inlined_call_operand.vmem [shape: f32[8,4], index: 1, kind: input, shape index: {}]   ;;  %s658_s2 = inlined_call_operand.vmem [shape: f32[8,1], index: 2, kind: input, shape index: {}]   ;;  %s659_s3 = inlined_call_operand.hbm [shape: f32[2,8,256], index: 3, kind: output, shape index: {}]  }
   0x1   :  { %10 = vsyncpa [#allocation3 + $0x1], 0  ;;  %s549_s12 = smov 0   ;;  %s551_s13 = smov 0  }
   0x2   :  { %s553_s14 = smov 0   ;;  %s555_s15 = smov 0  }
   0x3   :  { %s557_s16 = smov 0   ;;  %s559_s17 = smov 0  }
   0x4 LB: > { %s365_s18 = sadd.s32 4294967295, %s523_s17   ;;  %s366_s19 = sadd.s32 4294967294, %s523_s17   ;;  %s523_s17 = sphi %s559_s17, %s16_s17   ;;  %s519_s16 = sphi %s557_s16, %s666_s16   ;;  %s515_s15 = sphi %s555_s15, %s665_s15   ;;  %s511_s14 = sphi %s553_s14, %s664_s14   ;;  %s507_s13 = sphi %s551_s13, %s663_s13   ;;  %s503_s12 = sphi %s549_s12, %s662_s12  }
   0x5   : > { %s28_s20 = sadd.s32 1, %s519_s16  ;;  %s107_s21 = sadd.s32 1, %s511_s14 }
   0x6   : > { %p30_p0 = scmp.ge.s32.totalorder %s28_s20, 2  ;;  %p117_p1 = scmp.ne.s32.totalorder %s511_s14, %s507_s13 }
   0x7   : > { %p118_p2 = scmp.eq.s32.totalorder %s365_s18, 1  ;;  %p123_p3 = scmp.ne.s32.totalorder %s507_s13, %s503_s12 }
   0x8   : > { %s668_s20 = smov (%p30_p0, %s28_s20), 0  ;;  %p124_p5 = scmp.eq.s32.totalorder %s366_s19, 1 }
   0x9   : > { %p589_p4 = por %p118_p2, %p117_p1  ;;  %s102_s23 = ssub.s32 %s519_s16, %s668_s20 }
   0xa   : > { %p369_p6 = scmp.ge.s32.totalorder %s523_s17, 1  ;;  %p105_p7 = scmp.eq.s32.totalorder %s102_s23, 0 }
   0xb   : > { %p596_p8 = por %p124_p5, %p123_p3  ;;  %p161_p9 = scmp.lt.s32.totalorder %s523_s17, 3 }
   0xc   : > { %s602_s25 = scalar_select %p105_p7, %s511_s14, %s107_s21  }
   0xd   : > { %p162_p10 = pnand %p369_p6, %p161_p9 }
   0xe   : > { %p190_p11 = scmp.lt.s32.totalorder (!%p162_p10), %s515_s15, 1  ;;  %s186_s8 = sand.u32 (!%p162_p10), 1, %s507_s13  }
   0xf   : > { %165 = sbr.rel (%p162_p10) target bundleno = 160 (0xa0), region = 32  ;;  %s370_s9 = sshll.u32 (!%p162_p10), %s186_s8, 4 }
  0x10   : > { %s379_s10 = sshll.u32 (!%p162_p10), %s515_s15, 4  ;;  %s188_s21 = scalar_lea.vmem (!%p162_p10), [#allocation2], %s370_s9 }
  0x11   : > { %s284_s19 = scalar_lea.hbm (!%p162_p10), %s659_s3, %s379_s10  ;;  %s286_s23 = sshll.u32 (!%p162_p10), %s188_s21, 4  ;;  %s287_s23 = int_to_ptr.vmem [resolvable:$true] %s286_s23 }
  0x12   : > { %s271_s26 = scalar_lea.sflag (!%p162_p10), [#allocation3], %s186_s8 }
  0x14   : > { %v201_v0 = vld [vmem:[%s657_s1] sm:$0xff]  ;;  %v525_v1 = vmov 0   ;;  %v526_v2 = vmov 2   ;;  %v527_v4 = vmov 1   ;;  %v528_v5 = vmov 3   ;;  %s191_s30 = scalar_select %p190_p11, %s515_s15, 1 }
  0x15   : > { %439 = vset.pattern.permute.xlu0 %v525_v1  ;;  %441 = vset.pattern.permute.xlu1 %v526_v2  ;;  %v260_v3 = vld [vmem:[%s658_s2] sm:$0xff]  ;;  %s288_s15 = sshll.u32 %s284_s19, 4  ;;  %s289_s15 = int_to_ptr.hbm [resolvable:$true] %s288_s15 }
  0x16   : > { %204 = vperm.xlu0 %439, %v201_v0   ;;  %233 = vperm.xlu1 %441, %v201_v0   ;;  %s378_s4 = sshll.u32 %s191_s30, 3  ;;  %s459_s27 = sshra.s32 %s289_s15, 4  ;;  %s460_s27 = int_to_ptr.hbm [resolvable:$true] %s459_s27 }
  0x17   : > { %443 = vset.pattern.permute.xlu2 %v525_v1  ;;  %s197_s7 = scalar_lea.vmem %s656_s0, %s378_s4  ;;  %s461_s28 = scalar_lea.hbm %s460_s27, 16 }
  0x18   : > { %263 = vperm.xlu2 %443, %v260_v3   ;;  %v200_v6 = vld [vmem:[%s197_s7] sm:$0xff]  ;;  %p462_p12 = scmp.ne.s32.totalorder %s460_s27, %s461_s28  ;;  %s465_s4 = scalar_lea.hbm %s659_s3, 32 }
  0x19   : > { %v208_v9 = vperm.slane %v200_v6, 0  ;;  %v209_v10 = vperm.slane %v200_v6, 4  ;;  %v222_v11 = vperm.slane %v200_v6, 1  ;;  %v223_v12 = vperm.slane %v200_v6, 5  ;;  %p466_p1 = scmp.lt.s32.totalorder %s460_s27, %s659_s3  ;;  %p467_p2 = scmp.lt.s32.totalorder %s465_s4, %s461_s28 }
  0x1a   : > { %v236_v13 = vperm.slane %v200_v6, 2  ;;  %v237_v14 = vperm.slane %v200_v6, 6  ;;  %v250_v15 = vperm.slane %v200_v6, 3  ;;  %v251_v16 = vperm.slane %v200_v6, 7  ;;  %p463_p13 = pnand %p462_p12, %p589_p4 }
  0x1b   : > { %v212_v17 = vperm.slane %v208_v9, 0  ;;  %v213_v18 = vperm.slane %v209_v10, 0  ;;  %v226_v19 = vperm.slane %v222_v11, 1  ;;  %v227_v20 = vperm.slane %v223_v12, 1  ;;  %p468_p3 = por %p467_p2, %p466_p1 }
  0x1c   : > { %v240_v21 = vperm.slane %v236_v13, 2  ;;  %v241_v22 = vperm.slane %v237_v14, 2  ;;  %v254_v23 = vperm.slane %v250_v15, 3  ;;  %v255_v24 = vperm.slane %v251_v16, 3  ;;  %p464_p0 = pneg %p463_p13 }
  0x1e   : > { %440 = vset.pattern.permute.xlu0 %v527_v4  ;;  %442 = vset.pattern.permute.xlu1 %v528_v5  ;;  %p469_p5 = pnand %p468_p3, %p464_p0 }
  0x1f   : > { %219 = vperm.xlu0 %440, %v201_v0   ;;  %247 = vperm.xlu1 %442, %v201_v0  }
  0x27   : > { %444 = vset.pattern.permute.xlu0 %v525_v1 }
  0x72   : > { %v264_v39 = vpop.permute.xlu2 %263 }
  0x88   : > { %v205_v7 = vpop.permute.xlu0 %204  ;;  %v234_v8 = vpop.permute.xlu1 %233 }
  0x89   : > { %v214_v27 = vmul.f32 %v212_v17, %v205_v7  ;;  %v215_v28 = vmul.f32 %v213_v18, %v205_v7  ;;  %v242_v31 = vmul.f32 %v240_v21, %v234_v8  ;;  %v243_v32 = vmul.f32 %v241_v22, %v234_v8 }
  0x91   : > { %v220_v25 = vpop.permute.xlu0 %219  ;;  %v248_v26 = vpop.permute.xlu1 %247 }
  0x92   : > { %v228_v29 = vmul.f32 %v226_v19, %v220_v25  ;;  %v229_v30 = vmul.f32 %v227_v20, %v220_v25  ;;  %v256_v35 = vmul.f32 %v254_v23, %v248_v26  ;;  %v257_v36 = vmul.f32 %v255_v24, %v248_v26 }
  0x94   : > { %v230_v33 = vadd.f32 %v228_v29, %v214_v27  ;;  %v231_v34 = vadd.f32 %v229_v30, %v215_v28 }
  0x96   : > { %v244_v37 = vadd.f32 %v242_v31, %v230_v33  ;;  %v245_v38 = vadd.f32 %v243_v32, %v231_v34 }
  0x98   : > { %v258_v40 = vadd.f32 %v256_v35, %v244_v37  ;;  %v259_v41 = vadd.f32 %v257_v36, %v245_v38 }
  0x9a   : > { %v266_v42 = vadd.f32 %v264_v39, %v258_v40  ;;  %v267_v43 = vadd.f32 %v264_v39, %v259_v41 }
  0x9c   : > { %268 = vst [vmem:[%s188_s21] sm:$0xff] %v266_v42 }
  0x9d   : > { %269 = vst [vmem:[%s188_s21 + $0x8] sm:$0xff] %v267_v43 }
  0x9e   : > { %472 = shalt.err (!%p469_p5)
}
  0x9f   : > { %380 = dma.vmem_to_hbm [thread:$0]  (%p589_p4), %s287_s23, 256, %s289_s15, %s271_s26  }
  0xa0 PF: > { %p386_p6 = scmp.ge.s32.totalorder %s523_s17, 2  ;;  %s300_s7 = sand.u32 1, %s503_s12  }
  0xa1   : > { %s301_s8 = scalar_lea.sflag [#allocation3], %s300_s7 }
  0xa2   : > { %p383_p7 = pnand %p386_p6, %p596_p8 }
  0xa4   : > { %p384_p9 = pneg %p383_p7 }
  0xa6   : > { %498 = dma.done.wait (%p384_p9), %s301_s8, 256  }
  0xa7   : > { %500 = vsyncadd (%p384_p9), %s301_s8, 4294967040  ;;  %s16_s17 = sadd.s32 1, %s523_s17   ;;  %s662_s12 = smov %s507_s13 }
  0xa8   : > { %p13_p10 = scmp.ge.s32.totalorder %s16_s17, 4   ;;  %s663_s13 = smov %s511_s14 }
  0xa9   : > { %s664_s14 = smov %s602_s25  ;;  %s665_s15 = smov %s519_s16 }
  0xaa   : > { %s666_s16 = smov %s668_s20  ;;  %15 = sbr.rel (!%p13_p10) target bundleno = 4 (0x4), region = 67 }
  0xaf   :  { %307 = vsyncpa [#allocation3], 1 }
  0xb0   :  { %309 = vsyncpa [#allocation3 + $0x1], 1 }

</bundles_post_ra>
